<compile_context>
chip_gen: v6e
topology: v6e:2x2x1
jax: 0.10.0
libtpu: 0.0.40
codegen_flags: <defaults>
</compile_context>

<pallas_src>
import numpy as np
import jax
import jax.numpy as jnp
from jax.experimental import pallas as pl
from jax.experimental.pallas import tpu as pltpu


# ----------------------------------------------------------------------------
# Trace-time glue: zigzag coords + orthonormal DCT-II matrix + fused transform
# ----------------------------------------------------------------------------
def get_dct_vector_coords(r=128):
    """Zigzag-order coordinates (identical to the PyTorch reference)."""
    dct_index = []
    for i in range(r):
        if i % 2 == 0:
            dct_index.extend([(i - j, j) for j in range(i + 1)])
        else:
            dct_index.extend([(j, i - j) for j in range(i + 1)])
    for i in range(r, 2 * r - 1):
        if i % 2 == 0:
            dct_index.extend([(i - j, j) for j in range(i - r + 1, r)])
        else:
            dct_index.extend([(j, i - j) for j in range(i - r + 1, r)])
    return np.asarray(dct_index)


def dct_matrix(n):
    """Orthonormal DCT-II matrix D so that dct(v, norm='ortho') == D @ v."""
    k = np.arange(n)[:, None].astype(np.float64)
    m = np.arange(n)[None, :].astype(np.float64)
    d = np.sqrt(2.0 / n) * np.cos(np.pi * (2.0 * m + 1.0) * k / (2.0 * n))
    d[0, :] *= 1.0 / np.sqrt(2.0)
    return d.astype(np.float32)


def build_fused_transform(height, width, coords, k_pad, v_pad):
    """T[h*W+w, v] = D_H[xs[v], h] * D_W[ys[v], w], zero-padded to (k_pad, v_pad)."""
    vec_dim = coords.shape[0]
    xs, ys = coords[:, 0], coords[:, 1]
    d_h = dct_matrix(height)   # (H, H)
    d_w = dct_matrix(width)    # (W, W)
    t = d_h[xs][:, :, None] * d_w[ys][:, None, :]        # (V, H, W)
    t = t.reshape(vec_dim, height * width).T              # (H*W, V)
    t_full = np.zeros((k_pad, v_pad), dtype=np.float32)   # lane-dense, zero padded
    t_full[: height * width, :vec_dim] = t
    return jnp.asarray(t_full)


# ----------------------------------------------------------------------------
# Pallas kernels
# ----------------------------------------------------------------------------
def _dct_matmul_single_k(x_ref, t_ref, o_ref):
    # T fully resident; one matmul per row tile, single unmasked store.
    o_ref[...] = jnp.dot(x_ref[...], t_ref[...],
                         preferred_element_type=jnp.float32)


def _dct_matmul_tiled_k(x_ref, t_ref, o_ref):
    # Output block index depends only on the M grid axis -> o_ref is VMEM
    # resident across the K ("arbitrary") axis; accumulate into it directly.
    prod = jnp.dot(x_ref[...], t_ref[...], preferred_element_type=jnp.float32)

    @pl.when(pl.program_id(1) == 0)
    def _init():
        o_ref[...] = prod

    @pl.when(pl.program_id(1) != 0)
    def _acc():
        o_ref[...] += prod


# ----------------------------------------------------------------------------
# Tiling heuristics
# ----------------------------------------------------------------------------
def _round_up(a, b):
    return (a + b - 1) // b * b


def _vmem_budget_and_limit():
    """Generation-aware VMEM budget (for the tiler) and scoped limit."""
    cap = None
    try:
        cap = pltpu.get_tpu_info().vmem_capacity_bytes
    except Exception:
        cap = None
    if cap is None:
        cap = 64 * 1024 * 1024                      # assume the smallest (v7x)
    if cap >= 96 * 1024 * 1024:                     # v5e / v6e: 128 MiB physical
        return 84 * 1024 * 1024, 100 * 1024 * 1024
    return 36 * 1024 * 1024, 48 * 1024 * 1024       # v7x: 64 MiB physical


def _choose_tiles(m, hw, v_pad, x_itemsize, out_itemsize, budget):
    """Pick (tm, tk).  Prefer tk = H*W (T resident, streamed once); otherwise
    K-tile while keeping tm as large as possible (T is re-streamed once per
    row tile, so fewer/larger row tiles minimize redundant T traffic)."""
    m8 = _round_up(max(m, 1), 8)
    cands = [t for t in (2048, 1024, 512, 256, 128, 64, 32, 16, 8) if t <= m8]
    if m8 <= 2048:
        cands.append(m8)                             # full-M single tile option
    cands = sorted(set(cands), reverse=True)

    def footprint(tm, tk, k_tiles):
        x_b = 2 * tm * tk * x_itemsize               # double-buffered X tiles
        t_b = (1 if k_tiles == 1 else 2) * tk * v_pad * x_itemsize
        o_b = 2 * tm * v_pad * out_itemsize          # double-buffered output
        return x_b + t_b + o_b

    tm_sel, tk_sel = None, None
    # Pass 1: keep T fully resident (no K tiling, no K padding, no re-streaming).
    for tm in cands:
        if footprint(tm, hw, 1) <= budget:
            tm_sel, tk_sel = tm, hw
            break
    if tm_sel is None:
        # Pass 2: K tiling.  Maximize tm first, then largest lane-aligned tk.
        for tm in cands:
            tk = max((hw // 128) * 128, 128)
            while tk > 128 and footprint(tm, tk, 2) > budget:
                tk = _round_up(tk // 2, 128)
            if footprint(tm, tk, 2) <= budget:
                tm_sel, tk_sel = tm, tk
                break
        if tm_sel is None:
            tm_sel, tk_sel = 8, 128                  # last resort

    # Megacore (v7x): guarantee >=2 steps on the parallel M axis so the second
    # TensorCore has work.  Costs at most one extra ~0.35us step on 1-TC chips.
    m_pad = _round_up(m8, tm_sel)
    if m_pad // tm_sel == 1 and m8 >= 16:
        tm_sel = _round_up(m8 // 2, 8)
    return tm_sel, tk_sel


# ----------------------------------------------------------------------------
# Wrapper
# ----------------------------------------------------------------------------
def dct_module_forward(x, vec_dim, compute_dtype=jnp.float32):
    """Pallas implementation of DCTModule.forward.

    x: (B, C, H, W) float32.  Returns (B, C, vec_dim) float32.
    compute_dtype: jnp.float32 (default, bit-accurate path) or jnp.bfloat16
      (halves HBM traffic; accumulation stays f32 on the MXU).
    """
    b, c, h, w = x.shape
    m = b * c
    hw = h * w

    coords_all = get_dct_vector_coords(r=h)
    assert vec_dim <= hw and vec_dim <= coords_all.shape[0], \
        "vec_dim exceeds the number of available DCT coefficients"
    coords = coords_all[:vec_dim]
    # The reference builds the zigzag over (H, H); guard non-square misuse.
    assert int(coords[:, 0].max()) < h and int(coords[:, 1].max()) < w, \
        "zigzag coordinates exceed the spatial extent (non-square input too small in W)"

    v_pad = _round_up(vec_dim, 128)                 # lane-dense output columns
    x_item = jnp.dtype(compute_dtype).itemsize

    budget, vmem_limit = _vmem_budget_and_limit()
    tm, tk = _choose_tiles(m, hw, v_pad, x_item, 4, budget)

    m_pad = _round_up(m, tm)
    k_pad = _round_up(hw, tk)
    k_tiles = k_pad // tk
    m_tiles = m_pad // tm

    t = build_fused_transform(h, w, coords, k_pad, v_pad).astype(compute_dtype)

    x_flat = x.reshape(m, hw).astype(compute_dtype)
    if m_pad != m or k_pad != hw:
        # Only needed when the tiles do not divide the problem (rare: very
        # large H*W or M not a multiple of 8 / of the megacore split).
        x_flat = jnp.pad(x_flat, ((0, m_pad - m), (0, k_pad - hw)))

    # T is fetched once when resident, re-streamed per row tile when K-tiled.
    t_bytes = (k_pad * v_pad * x_item) if k_tiles == 1 \
        else (m_tiles * k_pad * v_pad * x_item)
    cost = pl.CostEstimate(
        flops=2 * m_pad * k_pad * v_pad,
        transcendentals=0,
        bytes_accessed=m_pad * k_pad * x_item + t_bytes + m_pad * v_pad * 4,
    )

    if k_tiles == 1:
        out = pl.pallas_call(
            _dct_matmul_single_k,
            out_shape=jax.ShapeDtypeStruct((m_pad, v_pad), jnp.float32),
            grid_spec=pltpu.PrefetchScalarGridSpec(
                num_scalar_prefetch=0,
                grid=(m_tiles,),
                in_specs=[
                    pl.BlockSpec((tm, k_pad), lambda i: (i, 0)),
                    pl.BlockSpec((k_pad, v_pad), lambda i: (0, 0)),  # resident
                ],
                out_specs=pl.BlockSpec((tm, v_pad), lambda i: (i, 0)),
            ),
            compiler_params=pltpu.CompilerParams(
                dimension_semantics=("parallel",),
                vmem_limit_bytes=vmem_limit,
            ),
            cost_estimate=cost,
        )(x_flat, t)
    else:
        out = pl.pallas_call(
            _dct_matmul_tiled_k,
            out_shape=jax.ShapeDtypeStruct((m_pad, v_pad), jnp.float32),
            grid_spec=pltpu.PrefetchScalarGridSpec(
                num_scalar_prefetch=0,
                grid=(m_tiles, k_tiles),
                in_specs=[
                    pl.BlockSpec((tm, tk), lambda i, k: (i, k)),
                    pl.BlockSpec((tk, v_pad), lambda i, k: (k, 0)),
                ],
                out_specs=pl.BlockSpec((tm, v_pad), lambda i, k: (i, 0)),
            ),
            compiler_params=pltpu.CompilerParams(
                dimension_semantics=("parallel", "arbitrary"),
                vmem_limit_bytes=vmem_limit,
            ),
            cost_estimate=cost,
        )(x_flat, t)

    # Strip V-lane padding and any M padding, restore (B, C, vec_dim).
    return out[:m, :vec_dim].reshape(b, c, vec_dim)


# ----------------------------------------------------------------------------
# Pure-JAX reference (DCT then zigzag gather, mirroring torch_dct.dct_2d)
# ----------------------------------------------------------------------------
def dct_module_reference(x, vec_dim):
    b, c, h, w = x.shape
    d_h = jnp.asarray(dct_matrix(h))
    d_w = jnp.asarray(dct_matrix(w))
    # dct_2d(x) = D_H @ x @ D_W^T (applied over the last two dims)
    dct_all = jnp.einsum("hp,bcpq,wq->bchw", d_h, x, d_w)
    coords = get_dct_vector_coords(r=h)[:vec_dim]
    xs, ys = coords[:, 0], coords[:, 1]
    return dct_all[:, :, xs, ys]


if __name__ == "__main__":
    B, C, H, W = 2, 4, 16, 16
    VEC_DIM = 32

    key = jax.random.PRNGKey(0)
    x = jax.random.normal(key, (B, C, H, W), dtype=jnp.float32)

    ref = dct_module_reference(x, VEC_DIM)

    # Default f32 path (bit-accurate vs. the reference).
    out = jax.block_until_ready(dct_module_forward(x, VEC_DIM))
    assert out.shape == (B, C, VEC_DIM)
    np.testing.assert_allclose(np.asarray(out), np.asarray(ref),
                               rtol=1e-4, atol=1e-4)

    # bf16 fast path: halves dominant HBM traffic, f32 accumulation on the MXU.
    out_bf16 = jax.block_until_ready(
        dct_module_forward(x, VEC_DIM, compute_dtype=jnp.bfloat16))
    np.testing.assert_allclose(np.asarray(out_bf16), np.asarray(ref),
                               rtol=3e-2, atol=3e-2)

    print("KERNEL_OK")
</pallas_src>

<mosaic_0001>
module attributes {stable_mosaic.version = 11 : i64} {
  func.func @_dct_matmul_single_k(%arg0: i32, %arg1: memref<8x256xf32, #tpu.memory_space<vmem>>, %arg2: memref<256x128xf32, #tpu.memory_space<vmem>>, %arg3: memref<8x128xf32, #tpu.memory_space<vmem>>) attributes {dimension_semantics = [#tpu.dimension_semantics<parallel>], iteration_bounds = array<i64: 1>, scalar_prefetch = 0 : i64, scratch_operands = 0 : i64, tpu.core_type = #tpu.core_type<tc>, window_params = [{transform_indices = @transform_0, window_bounds = array<i64: 8, 256>}, {pipeline_mode = #tpu.pipeline_mode<synchronous>, transform_indices = @transform_1, window_bounds = array<i64: 256, 128>}, {transform_indices = @transform_2, window_bounds = array<i64: 8, 128>}]} {
    %c0 = arith.constant 0 : index
    %c0_0 = arith.constant 0 : index
    %0 = vector.load %arg1[%c0, %c0_0] : memref<8x256xf32, #tpu.memory_space<vmem>>, vector<8x256xf32>
    %c0_1 = arith.constant 0 : index
    %c0_2 = arith.constant 0 : index
    %1 = vector.load %arg2[%c0_1, %c0_2] : memref<256x128xf32, #tpu.memory_space<vmem>>, vector<256x128xf32>
    %cst = arith.constant dense<0.000000e+00> : vector<8x128xf32>
    %2 = tpu.matmul %0, %1, %cst {dimension_numbers = #tpu.dot_dimension_numbers<[1], [0], [0], [1], [0, 0, 1, 1], [], []>} : vector<8x256xf32>, vector<256x128xf32>, vector<8x128xf32> -> vector<8x128xf32>
    %c0_3 = arith.constant 0 : index
    %c0_4 = arith.constant 0 : index
    %3 = vector.load %arg3[%c0_3, %c0_4] : memref<8x128xf32, #tpu.memory_space<vmem>>, vector<8x128xf32>
    tpu.vector_store %arg3[%c0_3, %c0_4], %2 {strides = array<i32>} : memref<8x128xf32, #tpu.memory_space<vmem>>, vector<8x128xf32>,
    return
  }
  func.func @transform_0(%arg0: i32) -> (i32, i32) {
    %c0_i32 = arith.constant 0 : i32
    %c0_i32_0 = arith.constant 0 : i32
    return %arg0, %c0_i32 : i32, i32
  }
  func.func @transform_1(%arg0: i32) -> (i32, i32) {
    %c0_i32 = arith.constant 0 : i32
    %c0_i32_0 = arith.constant 0 : i32
    %c0_i32_1 = arith.constant 0 : i32
    return %c0_i32, %c0_i32_0 : i32, i32
  }
  func.func @transform_2(%arg0: i32) -> (i32, i32) {
    %c0_i32 = arith.constant 0 : i32
    %c0_i32_0 = arith.constant 0 : i32
    return %arg0, %c0_i32 : i32, i32
  }
}

</mosaic_0001>

<bundles_post_ra>
// kernel: tpu_custom_call.1
= control target key start
LH: loop header
LB: loop body
LE: loop exit
PB: predicated region body
PF: predicated region fallthrough
CT: control target
= control target key end

     0   :  { %7 = vsyncpa [#allocation3], 0  ;;  %s294_s0 = inlined_call_operand.hbm [shape: f32[8,256], index: 0, kind: input, shape index: {}]   ;;  %s295_s1 = inlined_call_operand.hbm [shape: f32[256,128], index: 1, kind: input, shape index: {}]   ;;  %s296_s2 = inlined_call_operand.hbm [shape: f32[8,128], index: 2, kind: output, shape index: {}]  }
   0x1   :  { %8 = vsyncpa [#allocation6], 0 }
   0x2   :  { %9 = vsyncpa [#allocation4], 0  ;;  %s265_s9 = smov [#allocation2]   ;;  %s266_s11 = smov [#allocation5]  }
   0x3   :  { %s16_s10 = sshll.u32 %s265_s9, 4  ;;  %s25_s12 = sshll.u32 %s266_s11, 4  ;;  %s17_s10 = int_to_ptr.vmem [resolvable:$true] %s16_s10  ;;  %s26_s12 = int_to_ptr.vmem [resolvable:$true] %s25_s12 }
   0x4   :  { %s207_s13 = scalar_lea.vmem %s17_s10, 256  ;;  %p212_p1 = scmp.lt.s32.totalorder %s17_s10, %s17_s10 }
   0x5   :  { %p208_p0 = scmp.ne.s32.totalorder %s17_s10, %s207_s13  ;;  %p213_p2 = scmp.lt.s32.totalorder %s207_s13, %s207_s13 }
   0x7   :  { %p214_p3 = por %p213_p2, %p212_p1 }
   0x9   :  { %p215_p4 = pnand %p214_p3, %p208_p0 }
   0xb   :  { %218 = shalt.err (!%p215_p4)
}
   0xc   :  { %19 = dma.hbm_to_vmem [thread:$0]  %s294_s0, 256, %s17_s10, [#allocation3]  }
   0xd   :  { %s227_s16 = scalar_lea.vmem %s26_s12, 4096  ;;  %p232_p6 = scmp.lt.s32.totalorder %s26_s12, %s26_s12 }
   0xe   :  { %p228_p5 = scmp.ne.s32.totalorder %s26_s12, %s227_s16  ;;  %p233_p7 = scmp.lt.s32.totalorder %s227_s16, %s227_s16 }
  0x10   :  { %p234_p8 = por %p233_p7, %p232_p6 }
  0x12   :  { %p235_p9 = pnand %p234_p8, %p228_p5 }
  0x14   :  { %238 = shalt.err (!%p235_p9)
}
  0x15   :  { %s267_s17 = smov 128   ;;  %s268_s18 = smov 8  }
  0x16   :  { %31 = dma.hbm_to_vmem [thread:$0]  %s295_s1, 4096, %s26_s12, [#allocation6], %s267_s17, %s267_s17, %s268_s18  }
  0x17   :  { %259 = dma.done.wait [#allocation3], 256  }
  0x18   :  { %260 = vsyncadd [#allocation3], 4294967040 }
  0x19   :  { %261 = dma.done.wait [#allocation6], 4096  }
  0x1a   :  { %262 = vsyncadd [#allocation6], 4294963200  ;;  %v71_v0 = vld [vmem:[#allocation5 + $0xf8] sm:$0xff]  ;;  %v70_v2 = vld [vmem:[#allocation5 + $0xf0] sm:$0xff]  ;;  %s269_s0 = smov [#allocation7]  }
  0x1b   :  { %v55_v1 = vld [vmem:[#allocation5 + $0x78] sm:$0xff]  ;;  %159 = vmatprep.subr.mxu0 %v71_v0  ;;  %v54_v3 = vld [vmem:[#allocation5 + $0x70] sm:$0xff]  ;;  %v69_v4 = vld [vmem:[#allocation5 + $0xe8] sm:$0xff]  ;;  %s149_s1 = sshll.u32 %s269_s0, 4  ;;  %s150_s1 = int_to_ptr.vmem [resolvable:$true] %s149_s1 }
  0x1c   :  { %160 = vmatpush3.msra.mxu0 %v55_v1  ;;  %v53_v5 = vld [vmem:[#allocation5 + $0x68] sm:$0xff]  ;;  %v68_v6 = vld [vmem:[#allocation5 + $0xe0] sm:$0xff]  ;;  %v67_v8 = vld [vmem:[#allocation5 + $0xd8] sm:$0xff]  ;;  %s239_s21 = scalar_lea.vmem %s150_s1, 128  ;;  %p244_p11 = scmp.lt.s32.totalorder %s150_s1, %s150_s1 }
  0x1d   :  { %161 = vmatprep.subr.mxu0 %v70_v2  ;;  %v52_v7 = vld [vmem:[#allocation5 + $0x60] sm:$0xff]  ;;  %v51_v9 = vld [vmem:[#allocation5 + $0x58] sm:$0xff]  ;;  %v66_v10 = vld [vmem:[#allocation5 + $0xd0] sm:$0xff]  ;;  %p240_p10 = scmp.ne.s32.totalorder %s150_s1, %s239_s21  ;;  %p245_p12 = scmp.lt.s32.totalorder %s239_s21, %s239_s21 }
  0x1e   :  { %162 = vmatpush3.msra.mxu0 %v54_v3  ;;  %v50_v11 = vld [vmem:[#allocation5 + $0x50] sm:$0xff]  ;;  %v65_v12 = vld [vmem:[#allocation5 + $0xc8] sm:$0xff]  ;;  %v39_v13 = vld [vmem:[#allocation2 + $0x8] sm:$0xff] }
  0x1f   :  { %163 = vmatprep.subr.mxu0 %v69_v4  ;;  %v49_v14 = vld [vmem:[#allocation5 + $0x48] sm:$0xff]  ;;  %136 = vmatprep.mubr.f32.mxu0 %v39_v13  ;;  %v64_v15 = vld [vmem:[#allocation5 + $0xc0] sm:$0xff]  ;;  %v63_v17 = vld [vmem:[#allocation5 + $0xb8] sm:$0xff]  ;;  %p246_p13 = por %p245_p12, %p244_p11 }
  0x20   :  { %164 = vmatpush3.msra.mxu0 %v53_v5  ;;  %v48_v16 = vld [vmem:[#allocation5 + $0x40] sm:$0xff]  ;;  %v47_v18 = vld [vmem:[#allocation5 + $0x38] sm:$0xff]  ;;  %v62_v19 = vld [vmem:[#allocation5 + $0xb0] sm:$0xff] }
  0x21   :  { %165 = vmatprep.subr.mxu0 %v68_v6  ;;  %v46_v20 = vld [vmem:[#allocation5 + $0x30] sm:$0xff]  ;;  %v61_v21 = vld [vmem:[#allocation5 + $0xa8] sm:$0xff]  ;;  %v60_v23 = vld [vmem:[#allocation5 + $0xa0] sm:$0xff]  ;;  %p247_p0 = pnand %p246_p13, %p240_p10 }
  0x22   :  { %166 = vmatpush3.msra.mxu0 %v52_v7  ;;  %v45_v22 = vld [vmem:[#allocation5 + $0x28] sm:$0xff]  ;;  %v44_v24 = vld [vmem:[#allocation5 + $0x20] sm:$0xff]  ;;  %v59_v25 = vld [vmem:[#allocation5 + $0x98] sm:$0xff] }
  0x23   :  { %167 = vmatprep.subr.mxu0 %v67_v8  ;;  %v43_v26 = vld [vmem:[#allocation5 + $0x18] sm:$0xff]  ;;  %v58_v27 = vld [vmem:[#allocation5 + $0x90] sm:$0xff]  ;;  %v57_v29 = vld [vmem:[#allocation5 + $0x88] sm:$0xff] }
  0x24   :  { %168 = vmatpush3.msra.mxu0 %v51_v9  ;;  %v42_v28 = vld [vmem:[#allocation5 + $0x10] sm:$0xff]  ;;  %v41_v30 = vld [vmem:[#allocation5 + $0x8] sm:$0xff]  ;;  %v56_v31 = vld [vmem:[#allocation5 + $0x80] sm:$0xff] }
  0x25   :  { %169 = vmatprep.subr.mxu0 %v66_v10  ;;  %v40_v32 = vld [vmem:[#allocation5] sm:$0xff]  ;;  %v38_v33 = vld [vmem:[#allocation2] sm:$0xff] }
  0x26   :  { %170 = vmatpush3.msra.mxu0 %v50_v11 }
  0x27   :  { %171 = vmatprep.subr.mxu0 %v65_v12 }
  0x28   :  { %172 = vmatpush3.msra.mxu0 %v49_v14 }
  0x29   :  { %173 = vmatprep.subr.mxu0 %v64_v15 }
  0x2a   :  { %174 = vmatpush3.msra.mxu0 %v48_v16 }
  0x2b   :  { %175 = vmatprep.subr.mxu0 %v63_v17 }
  0x2c   :  { %176 = vmatpush3.msra.mxu0 %v47_v18 }
  0x2d   :  { %177 = vmatprep.subr.mxu0 %v62_v19 }
  0x2e   :  { %178 = vmatpush3.msra.mxu0 %v46_v20 }
  0x2f   :  { %179 = vmatprep.subr.mxu0 %v61_v21 }
  0x30   :  { %180 = vmatpush3.msra.mxu0 %v45_v22 }
  0x31   :  { %181 = vmatprep.subr.mxu0 %v60_v23 }
  0x32   :  { %182 = vmatpush3.msra.mxu0 %v44_v24 }
  0x33   :  { %183 = vmatprep.subr.mxu0 %v59_v25 }
  0x34   :  { %184 = vmatpush3.msra.mxu0 %v43_v26 }
  0x35   :  { %185 = vmatprep.subr.mxu0 %v58_v27 }
  0x36   :  { %186 = vmatpush3.msra.mxu0 %v42_v28 }
  0x37   :  { %187 = vmatprep.subr.mxu0 %v57_v29 }
  0x38   :  { %188 = vmatpush3.msra.mxu0 %v41_v30 }
  0x39   :  { %189 = vmatprep.subr.mxu0 %v56_v31 }
  0x3a   :  { %190 = vmatpush3.msra.mxu0 %v40_v32 }
  0x3b   :  { %137 = vmatmul.mubr.f32.vlgmr.msra.gmra.mxu0 %v38_v33 }
  0xfb   :  { %v191_v34 = vpop.f32.mrf.mxu0 }
  0xfd   :  { %v192_v35 = vpop.f32.mrf.mxu0 }
  0xfe   :  { %v193_v36 = vadd.f32 %v192_v35, %v191_v34 }
 0x100   :  { %142 = vst [vmem:[#allocation7] sm:$0xff] %v193_v36 }
 0x101   :  { %250 = shalt.err (!%p247_p0)
}
 0x102   :  { %152 = dma.vmem_to_hbm [thread:$0]  %s150_s1, 128, %s296_s2, [#allocation4]  }
 0x103   :  { %263 = dma.done.wait [#allocation4], 128  }
 0x104   :  { %264 = vsyncadd [#allocation4], 4294967168 }
 0x105   :  { %156 = vsyncpa [#allocation3], 1 }
 0x106   :  { %157 = vsyncpa [#allocation6], 1 }
 0x107   :  { %158 = vsyncpa [#allocation4], 1 }

</bundles_post_ra>
